<compile_context>
chip_gen: v7x
topology: tpu7x:2x2x1
jax: 0.10.0
libtpu: 0.0.40
codegen_flags: <defaults>
</compile_context>

<pallas_src>
import functools
import math

import jax
import jax.numpy as jnp
import numpy as np
from jax.experimental import pallas as pl
from jax.experimental.pallas import tpu as pltpu


def graph_encoder_kernel(x_ref, adj_ref, mask_ref,        # VMEM (TB,N,H), (TB,N,N), (TB,1,N)
                         c1_ref, c2_ref, bf_ref,           # VMEM (1,H) x3, f32, resident
                         o_ref,                             # VMEM (TB,H) f32
                         *, inv_l):
    """One grid step processes a block of TB samples; all HxH algebra is pre-folded."""
    x = x_ref[...]          # [TB, N, H]  emb[nbrs] @ (W1@W2@Wf), compute dtype (bf16 default)
    adj = adj_ref[...]      # [TB, N, N]  adjacency, compute dtype
    mask = mask_ref[...]    # [TB, 1, N]  0/1 row-validity mask (exact in bf16)

    # Two [1,N]@[N,N] hops and one [1,N]@[N,H] hop per sample -- trivially cheap row
    # contractions with f32 accumulation; the kernel sits on the HBM roofline.
    # TODO(synk): for very small N/H deployments these could run as VPU broadcast-mul +
    # sublane reduces to avoid MXU sliver passes; irrelevant once memory-bound.
    r = jnp.einsum("bon,bnm->bom", mask, adj,
                   preferred_element_type=jnp.float32)                      # [TB,1,N]
    q = jnp.einsum("bom,bmn->bon", r.astype(adj.dtype), adj,
                   preferred_element_type=jnp.float32)                      # [TB,1,N]
    p = jnp.einsum("bon,bnh->boh", q.astype(x.dtype), x,
                   preferred_element_type=jnp.float32)[:, 0, :]             # [TB,H]

    rsum = jnp.sum(r, axis=2)                                               # [TB,1] = sum(mask@adj)
    nvalid = jnp.sum(mask.astype(jnp.float32), axis=2)                      # [TB,1] = len(cur_node)

    # pooled = (1/L_max) * (q@X + rsum*c1 + len*c2) ; fc1+ReLU epilogue in f32.
    pooled = inv_l * (p + rsum * c1_ref[...] + nvalid * c2_ref[...])        # [TB,H]
    o_ref[...] = jnp.maximum(pooled + bf_ref[...], 0.0)


def _choose_block_batch(batch, n, h, itemsize, budget_bytes):
    """Largest per-grid-step sample count whose double-buffered tiles fit `budget_bytes`.

    Batches >= 16 are split into >= 2 grid steps so the 'parallel' grid axis can shard
    across both v7x TensorCores and the x/adj DMAs pipeline across steps.
    """
    per_sample = 2 * ((n * h + n * n + n) * itemsize + h * 4)   # x+adj+mask in, out; x2 buffers
    fit = max(1, budget_bytes // per_sample)
    if fit >= batch:
        if batch >= 16:
            half = (batch + 1) // 2
            return max(8, (half // 8) * 8)       # >=2 steps, sublane-aligned output blocks
        return batch                             # tiny batch: one step, block == full array
    return max(8, (fit // 8) * 8)


def graph_encoder_forward(neighbors, adj, lengths, l_max, emb_table, params, *,
                          compute_dtype=jnp.bfloat16, block_batch=None):
    """neighbors [B,N] int32, adj [B,N,N] f32, lengths [B] int32, emb_table [E,D] f32 -> [B,1,H]."""
    B, N = neighbors.shape
    H = params["w1"].shape[1]
    hp = jax.lax.Precision.HIGHEST
    itemsize = jnp.dtype(compute_dtype).itemsize

    # ---- exact algebraic folding (done once per weight set, high precision) ----
    w12 = jnp.dot(params["w1"], params["w2"], precision=hp)                       # [D,H]
    w_all = jnp.dot(w12, params["wf"], precision=hp)                              # W1@W2@Wf
    c1 = jnp.dot(jnp.dot(params["b1"], params["w2"], precision=hp),
                 params["wf"], precision=hp).astype(jnp.float32)                  # b1@W2@Wf
    c2 = jnp.dot(params["b2"], params["wf"], precision=hp).astype(jnp.float32)    # b2@Wf
    bf = params["bf"].astype(jnp.float32)

    # Folded embedding gather (plain-JAX glue for the nn.Embedding lookup).
    # TODO(synk): when E*H fits VMEM, pass the folded [E,H] table as a resident VMEM input and
    # gather rows in-kernel from scalar-prefetched `neighbors` to kill this [B,N,H] HBM round trip.
    x = jnp.dot(emb_table, w_all, precision=hp)[neighbors].astype(compute_dtype)  # [B,N,H]

    adj = adj.astype(compute_dtype)                                                # [B,N,N]
    # 0/1 row-validity mask (exact in bf16); the 1/L_max mean scale is applied in f32 in-kernel.
    mask = (jnp.arange(N)[None, None, :] < lengths[:, None, None]).astype(compute_dtype)  # [B,1,N]

    # ---- block sizing against the real per-chip VMEM ----
    try:
        vmem_cap = int(pltpu.get_tpu_info().vmem_capacity_bytes)
    except Exception:
        vmem_cap = 64 * 1024 * 1024                       # conservative (v7x-sized) fallback
    vmem_limit = min((vmem_cap * 3) // 4, 96 * 1024 * 1024)   # ~96 MiB v5e/v6e, ~48 MiB v7x
    tile_budget = (vmem_limit * 3) // 4                        # headroom for biases/internal scratch
    tb = (_choose_block_batch(B, N, H, itemsize, tile_budget)
          if block_batch is None else block_batch)
    grid_b = -(-B // tb)
    b_pad = grid_b * tb
    if b_pad != B:
        pad = b_pad - B
        x = jnp.pad(x, ((0, pad), (0, 0), (0, 0)))
        adj = jnp.pad(adj, ((0, pad), (0, 0), (0, 0)))
        mask = jnp.pad(mask, ((0, pad), (0, 0), (0, 0)))

    # Post-collapse cost: 2x [1,N]@[N,N] + [1,N]@[N,H] per sample, bf16 bytes for x/adj/mask.
    cost = pl.CostEstimate(
        flops=2 * b_pad * (2 * N * N + N * H + 4 * H),
        transcendentals=0,
        bytes_accessed=b_pad * ((N * H + N * N + N) * itemsize + H * 4) + 3 * H * 4,
    )

    grid_spec = pltpu.PrefetchScalarGridSpec(
        num_scalar_prefetch=0,
        grid=(grid_b,),
        # TODO(synk): if profiling shows exposed DMA at step edges, add
        # pipeline_mode=pl.Buffered(3) to the x/adj specs and fold the extra buffer into
        # _choose_block_batch's budget.
        in_specs=[
            pl.BlockSpec((tb, N, H), lambda i: (i, 0, 0)),   # folded embeddings
            pl.BlockSpec((tb, N, N), lambda i: (i, 0, 0)),   # adjacency
            pl.BlockSpec((tb, 1, N), lambda i: (i, 0, 0)),   # validity mask
            pl.BlockSpec((1, H), lambda i: (0, 0)),          # c1 (resident across steps)
            pl.BlockSpec((1, H), lambda i: (0, 0)),          # c2 (resident)
            pl.BlockSpec((1, H), lambda i: (0, 0)),          # bf (resident)
        ],
        out_specs=pl.BlockSpec((tb, H), lambda i: (i, 0)),   # lane/sublane-dense [TB,H] slab
    )

    out = pl.pallas_call(
        functools.partial(graph_encoder_kernel, inv_l=float(1.0 / float(l_max))),
        out_shape=jax.ShapeDtypeStruct((b_pad, H), jnp.float32),
        grid_spec=grid_spec,
        compiler_params=pltpu.CompilerParams(
            dimension_semantics=("parallel",),        # grid steps shard across TCs on v7x
            vmem_limit_bytes=int(vmem_limit),
        ),
        cost_estimate=cost,
    )(x, adj, mask, c1, c2, bf)

    return out[:B, None, :]                           # [B, 1, H], matching the torch output


def reference_forward(neighbors, adj, lengths, l_max, emb_table, params):
    """Faithful (uncollapsed) formulation of the original module, 'mean' branch."""
    hp = jax.lax.Precision.HIGHEST
    x = emb_table[neighbors]                                                         # [B, N, D]
    s1 = jnp.einsum("bnd,dh->bnh", x, params["w1"], precision=hp)
    h = jnp.einsum("bnm,bmh->bnh", adj, s1, precision=hp) + params["b1"]
    s2 = jnp.einsum("bnh,hk->bnk", h, params["w2"], precision=hp)
    h = jnp.einsum("bnm,bmh->bnh", adj, s2, precision=hp) + params["b2"]
    mask = (jnp.arange(h.shape[1])[None, :, None] < lengths[:, None, None]).astype(h.dtype)
    pooled = jnp.sum(h * mask, axis=1, keepdims=True) / float(l_max)                 # [B, 1, H]
    return jax.nn.relu(jnp.einsum("bkh,hj->bkj", pooled, params["wf"], precision=hp)
                       + params["bf"])


if __name__ == "__main__":
    # small, deterministic shapes
    E, D, H = 64, 32, 32          # entity count, emb_size, hidden_size
    B, N = 2, 16                  # batch, neighbors per sample

    key = jax.random.PRNGKey(0)
    k_emb, k_nbr, k_adj, k1, k2, k3, k4, k5, k6 = jax.random.split(key, 9)

    emb_table = jax.random.normal(k_emb, (E, D), dtype=jnp.float32)
    neighbors = jax.random.randint(k_nbr, (B, N), 0, E, dtype=jnp.int32)

    # dense row-normalized adjacency (stand-in for torch.sparse adj)
    a = (jax.random.uniform(k_adj, (B, N, N)) > 0.6).astype(jnp.float32)
    a = a + jnp.eye(N)[None]                       # self loops
    adj = a / jnp.sum(a, axis=-1, keepdims=True)   # row normalize

    lengths_np = np.array([8, 6], dtype=np.int32)  # len(s['cur_node']) per sample
    lengths = jnp.asarray(lengths_np)
    l_max = int(lengths_np.max())                  # static padded seq length

    # GraphConvolution init: uniform(-stdv, stdv), stdv = 1/sqrt(out_features)
    stdv = 1.0 / math.sqrt(H)
    params = {
        "w1": jax.random.uniform(k1, (D, H), jnp.float32, -stdv, stdv),
        "b1": jax.random.uniform(k2, (1, H), jnp.float32, -stdv, stdv),
        "w2": jax.random.uniform(k3, (H, H), jnp.float32, -stdv, stdv),
        "b2": jax.random.uniform(k4, (1, H), jnp.float32, -stdv, stdv),
        # fc1 = Linear(H, H)
        "wf": jax.random.uniform(k5, (H, H), jnp.float32, -stdv, stdv),
        "bf": jax.random.uniform(k6, (1, H), jnp.float32, -stdv, stdv),
    }

    ref = reference_forward(neighbors, adj, lengths, l_max, emb_table, params)

    # f32 run: the algebraic collapse is exact -- only FP summation order changes.
    out_f32 = graph_encoder_forward(neighbors, adj, lengths, l_max, emb_table, params,
                                    compute_dtype=jnp.float32)
    out_f32 = jax.block_until_ready(out_f32)
    assert out_f32.shape == (B, 1, H)
    np.testing.assert_allclose(np.asarray(out_f32), np.asarray(ref), rtol=1e-3, atol=1e-3)

    # default bf16 run: halves HBM traffic; ~1e-3..1e-2 relative drift is the accepted trade.
    out = graph_encoder_forward(neighbors, adj, lengths, l_max, emb_table, params)
    out = jax.block_until_ready(out)
    assert out.shape == (B, 1, H)
    np.testing.assert_allclose(np.asarray(out), np.asarray(ref), rtol=2e-2, atol=2e-2)

    print("KERNEL_OK")
</pallas_src>

<mosaic_0001>
module attributes {stable_mosaic.version = 11 : i64} {
  func.func @graph_encoder_kernel(%arg0: i32, %arg1: memref<2x16x32xf32, #tpu.memory_space<vmem>>, %arg2: memref<2x16x16xf32, #tpu.memory_space<vmem>>, %arg3: memref<2x1x16xf32, #tpu.memory_space<vmem>>, %arg4: memref<1x32xf32, #tpu.memory_space<vmem>>, %arg5: memref<1x32xf32, #tpu.memory_space<vmem>>, %arg6: memref<1x32xf32, #tpu.memory_space<vmem>>, %arg7: memref<2x32xf32, #tpu.memory_space<vmem>>) attributes {dimension_semantics = [#tpu.dimension_semantics<parallel>], iteration_bounds = array<i64: 1>, scalar_prefetch = 0 : i64, scratch_operands = 0 : i64, tpu.core_type = #tpu.core_type<tc>, window_params = [{transform_indices = @transform_0, window_bounds = array<i64: 2, 16, 32>}, {transform_indices = @transform_1, window_bounds = array<i64: 2, 16, 16>}, {transform_indices = @transform_2, window_bounds = array<i64: 2, 1, 16>}, {pipeline_mode = #tpu.pipeline_mode<synchronous>, transform_indices = @transform_3, window_bounds = array<i64: 1, 32>}, {pipeline_mode = #tpu.pipeline_mode<synchronous>, transform_indices = @transform_4, window_bounds = array<i64: 1, 32>}, {pipeline_mode = #tpu.pipeline_mode<synchronous>, transform_indices = @transform_5, window_bounds = array<i64: 1, 32>}, {transform_indices = @transform_6, window_bounds = array<i64: 2, 32>}]} {
    %c0 = arith.constant 0 : index
    %c0_0 = arith.constant 0 : index
    %c0_1 = arith.constant 0 : index
    %0 = vector.load %arg1[%c0, %c0_0, %c0_1] : memref<2x16x32xf32, #tpu.memory_space<vmem>>, vector<2x16x32xf32>
    %c0_2 = arith.constant 0 : index
    %c0_3 = arith.constant 0 : index
    %c0_4 = arith.constant 0 : index
    %1 = vector.load %arg2[%c0_2, %c0_3, %c0_4] : memref<2x16x16xf32, #tpu.memory_space<vmem>>, vector<2x16x16xf32>
    %c0_5 = arith.constant 0 : index
    %c0_6 = arith.constant 0 : index
    %c0_7 = arith.constant 0 : index
    %2 = vector.load %arg3[%c0_5, %c0_6, %c0_7] : memref<2x1x16xf32, #tpu.memory_space<vmem>>, vector<2x1x16xf32>
    "tpu.trace_start"() <{level = 10 : i32, message = "bon,bnm->bom"}> : () -> ()
    %cst = arith.constant dense<0.000000e+00> : vector<2x1x16xf32>
    %3 = tpu.matmul %2, %1, %cst {dimension_numbers = #tpu.dot_dimension_numbers<[2], [1], [1], [2], [0, 0, 0, 1, 1, 2], [0], [0]>} : vector<2x1x16xf32>, vector<2x16x16xf32>, vector<2x1x16xf32> -> vector<2x1x16xf32>
    "tpu.trace_stop"() : () -> ()
    "tpu.trace_start"() <{level = 10 : i32, message = "bom,bmn->bon"}> : () -> ()
    %cst_8 = arith.constant dense<0.000000e+00> : vector<2x1x16xf32>
    %4 = tpu.matmul %3, %1, %cst_8 {dimension_numbers = #tpu.dot_dimension_numbers<[2], [1], [1], [2], [0, 0, 0, 1, 1, 2], [0], [0]>} : vector<2x1x16xf32>, vector<2x16x16xf32>, vector<2x1x16xf32> -> vector<2x1x16xf32>
    "tpu.trace_stop"() : () -> ()
    "tpu.trace_start"() <{level = 10 : i32, message = "bon,bnh->boh"}> : () -> ()
    %cst_9 = arith.constant dense<0.000000e+00> : vector<2x1x32xf32>
    %5 = tpu.matmul %4, %0, %cst_9 {dimension_numbers = #tpu.dot_dimension_numbers<[2], [1], [1], [2], [0, 0, 0, 1, 1, 2], [0], [0]>} : vector<2x1x16xf32>, vector<2x16x32xf32>, vector<2x1x32xf32> -> vector<2x1x32xf32>
    "tpu.trace_stop"() : () -> ()
    %6 = vector.shape_cast %5 : vector<2x1x32xf32> to vector<2x32xf32>
    %cst_10 = arith.constant dense<0.000000e+00> : vector<2x1xf32>
    %7 = vector.multi_reduction <add>, %3, %cst_10 [2] : vector<2x1x16xf32> to vector<2x1xf32>
    %cst_11 = arith.constant dense<0.000000e+00> : vector<2x1xf32>
    %8 = vector.multi_reduction <add>, %2, %cst_11 [2] : vector<2x1x16xf32> to vector<2x1xf32>
    %c0_12 = arith.constant 0 : index
    %c0_13 = arith.constant 0 : index
    %9 = vector.load %arg4[%c0_12, %c0_13] : memref<1x32xf32, #tpu.memory_space<vmem>>, vector<1x32xf32>
    %10 = vector.broadcast %7 : vector<2x1xf32> to vector<2x32xf32>
    %11 = vector.broadcast %9 : vector<1x32xf32> to vector<2x32xf32>
    %12 = arith.mulf %10, %11 : vector<2x32xf32>
    %13 = arith.addf %6, %12 : vector<2x32xf32>
    %c0_14 = arith.constant 0 : index
    %c0_15 = arith.constant 0 : index
    %14 = vector.load %arg5[%c0_14, %c0_15] : memref<1x32xf32, #tpu.memory_space<vmem>>, vector<1x32xf32>
    %15 = vector.broadcast %8 : vector<2x1xf32> to vector<2x32xf32>
    %16 = vector.broadcast %14 : vector<1x32xf32> to vector<2x32xf32>
    %17 = arith.mulf %15, %16 : vector<2x32xf32>
    %18 = arith.addf %13, %17 : vector<2x32xf32>
    %cst_16 = arith.constant 1.250000e-01 : f32
    %19 = vector.broadcast %cst_16 : f32 to vector<2x32xf32>
    %20 = arith.mulf %19, %18 : vector<2x32xf32>
    %c0_17 = arith.constant 0 : index
    %c0_18 = arith.constant 0 : index
    %21 = vector.load %arg6[%c0_17, %c0_18] : memref<1x32xf32, #tpu.memory_space<vmem>>, vector<1x32xf32>
    %22 = vector.broadcast %21 : vector<1x32xf32> to vector<2x32xf32>
    %23 = arith.addf %20, %22 : vector<2x32xf32>
    %cst_19 = arith.constant 0.000000e+00 : f32
    %24 = vector.broadcast %cst_19 : f32 to vector<2x32xf32>
    %25 = arith.maximumf %23, %24 : vector<2x32xf32>
    %c0_20 = arith.constant 0 : index
    %c0_21 = arith.constant 0 : index
    %26 = vector.load %arg7[%c0_20, %c0_21] : memref<2x32xf32, #tpu.memory_space<vmem>>, vector<2x32xf32>
    tpu.vector_store %arg7[%c0_20, %c0_21], %25 {strides = array<i32>} : memref<2x32xf32, #tpu.memory_space<vmem>>, vector<2x32xf32>,
    return
  }
  func.func @transform_0(%arg0: i32) -> (i32, i32, i32) {
    %c0_i32 = arith.constant 0 : i32
    %c0_i32_0 = arith.constant 0 : i32
    %c0_i32_1 = arith.constant 0 : i32
    return %arg0, %c0_i32, %c0_i32_0 : i32, i32, i32
  }
  func.func @transform_1(%arg0: i32) -> (i32, i32, i32) {
    %c0_i32 = arith.constant 0 : i32
    %c0_i32_0 = arith.constant 0 : i32
    %c0_i32_1 = arith.constant 0 : i32
    return %arg0, %c0_i32, %c0_i32_0 : i32, i32, i32
  }
  func.func @transform_2(%arg0: i32) -> (i32, i32, i32) {
    %c0_i32 = arith.constant 0 : i32
    %c0_i32_0 = arith.constant 0 : i32
    %c0_i32_1 = arith.constant 0 : i32
    return %arg0, %c0_i32, %c0_i32_0 : i32, i32, i32
  }
  func.func @transform_3(%arg0: i32) -> (i32, i32) {
    %c0_i32 = arith.constant 0 : i32
    %c0_i32_0 = arith.constant 0 : i32
    %c0_i32_1 = arith.constant 0 : i32
    return %c0_i32, %c0_i32_0 : i32, i32
  }
  func.func @transform_4(%arg0: i32) -> (i32, i32) {
    %c0_i32 = arith.constant 0 : i32
    %c0_i32_0 = arith.constant 0 : i32
    %c0_i32_1 = arith.constant 0 : i32
    return %c0_i32, %c0_i32_0 : i32, i32
  }
  func.func @transform_5(%arg0: i32) -> (i32, i32) {
    %c0_i32 = arith.constant 0 : i32
    %c0_i32_0 = arith.constant 0 : i32
    %c0_i32_1 = arith.constant 0 : i32
    return %c0_i32, %c0_i32_0 : i32, i32
  }
  func.func @transform_6(%arg0: i32) -> (i32, i32) {
    %c0_i32 = arith.constant 0 : i32
    %c0_i32_0 = arith.constant 0 : i32
    return %arg0, %c0_i32 : i32, i32
  }
}

</mosaic_0001>

<bundles_post_ra>
// kernel: tpu_custom_call.1
= control target key start
LH: loop header
LB: loop body
LE: loop exit
PB: predicated region body
PF: predicated region fallthrough
CT: control target
= control target key end

     0   :  { %11 = vsyncpa [#allocation3], 0  ;;  %s1093_s0 = inlined_call_operand.hbm [shape: f32[2,16,32], index: 0, kind: input, shape index: {}]   ;;  %s1094_s1 = inlined_call_operand.hbm [shape: f32[2,16,16], index: 1, kind: input, shape index: {}]   ;;  %s1095_s2 = inlined_call_operand.vmem [shape: f32[2,1,16], index: 2, kind: input, shape index: {}]   ;;  %s1096_s3 = inlined_call_operand.vmem [shape: f32[1,32], index: 3, kind: input, shape index: {}]   ;;  %s1097_s4 = inlined_call_operand.vmem [shape: f32[1,32], index: 4, kind: input, shape index: {}]   ;;  %s1098_s5 = inlined_call_operand.vmem [shape: f32[1,32], index: 5, kind: input, shape index: {}]   ;;  %s1099_s6 = inlined_call_operand.hbm [shape: f32[2,32], index: 6, kind: output, shape index: {}]  }
   0x1   :  { %12 = vsyncpa [#allocation6], 0 }
   0x2   :  { %13 = vsyncpa [#allocation4], 0  ;;  %s959_s21 = smov [#allocation2]   ;;  %s887_s25 = scalar_lea.hbm %s1093_s0, 512 }
   0x3   :  { %s19_s22 = sshll.u32 %s959_s21, 4  ;;  %p888_p0 = scmp.ne.s32.totalorder %s1093_s0, %s887_s25  ;;  %s20_s22 = int_to_ptr.vmem [resolvable:$true] %s19_s22 }
   0x4   :  { %p891_p1 = scmp.lt.u32.totalorder %s887_s25, %s1093_s0 }
   0x6   :  { %p893_p2 = pnand %p891_p1, %p888_p0 }
   0x8   :  { %896 = shalt.err (!%p893_p2)
}
   0x9   :  { %s897_s30 = scalar_lea.vmem %s20_s22, 512  ;;  %p902_p4 = scmp.lt.s32.totalorder %s20_s22, %s20_s22 }
   0xa   :  { %p898_p3 = scmp.ne.s32.totalorder %s20_s22, %s897_s30  ;;  %p903_p5 = scmp.lt.s32.totalorder %s897_s30, %s897_s30 }
   0xc   :  { %p904_p6 = por %p903_p5, %p902_p4 }
   0xe   :  { %p905_p7 = pnand %p904_p6, %p898_p3 }
  0x10   :  { %908 = shalt.err (!%p905_p7)
}
  0x11   :  { %s960_s7 = smov 128   ;;  %s961_s8 = smov 8  }
  0x12   :  { %25 = dma.hbm_to_vmem [thread:$0]  %s1093_s0, 512, %s20_s22, [#allocation3], %s960_s7, %s960_s7, %s961_s8  }
  0x13   :  { %s962_s11 = smov [#allocation5]   ;;  %s909_s15 = scalar_lea.hbm %s1094_s1, 512 }
  0x14   :  { %s31_s12 = sshll.u32 %s962_s11, 4  ;;  %p910_p8 = scmp.ne.s32.totalorder %s1094_s1, %s909_s15  ;;  %s32_s12 = int_to_ptr.vmem [resolvable:$true] %s31_s12 }
  0x15   :  { %p913_p9 = scmp.lt.u32.totalorder %s909_s15, %s1094_s1 }
  0x17   :  { %p915_p10 = pnand %p913_p9, %p910_p8 }
  0x19   :  { %918 = shalt.err (!%p915_p10)
}
  0x1a   :  { %s919_s20 = scalar_lea.vmem %s32_s12, 512  ;;  %p924_p12 = scmp.lt.s32.totalorder %s32_s12, %s32_s12 }
  0x1b   :  { %p920_p11 = scmp.ne.s32.totalorder %s32_s12, %s919_s20  ;;  %p925_p13 = scmp.lt.s32.totalorder %s919_s20, %s919_s20 }
  0x1d   :  { %p926_p0 = por %p925_p13, %p924_p12 }
  0x1f   :  { %p927_p1 = pnand %p926_p0, %p920_p11 }
  0x21   :  { %930 = shalt.err (!%p927_p1)
}
  0x22   :  { %37 = dma.hbm_to_vmem [thread:$0]  %s1094_s1, 512, %s32_s12, [#allocation6], %s960_s7, %s960_s7, %s961_s8  }
  0x23   :  { %953 = dma.done.wait [#allocation3], 512  }
  0x24   :  { %954 = vsyncadd [#allocation3], 4294966784 }
  0x25   :  { %955 = dma.done.wait [#allocation6], 512  }
  0x26   :  { %956 = vsyncadd [#allocation6], 4294966784  ;;  %v963_v0 = vmov 0.0|0.0   ;;  %vm964_vm0 = vmmov 0   ;;  %v965_v1 = vmov 0.0   ;;  %vm501_vm1 = vcmask 122880  }
  0x27   :  { %858 = vmatprep.subr.bf16.mxu0 %v963_v0  ;;  %861 = vmatprep.subr.bf16.mxu1 %v963_v0  ;;  %v56_v2 = vld [vmem:[#allocation5] sm:$0xff]  ;;  %v57_v3 = vld [vmem:[#allocation5 + $0x8] sm:$0xff]  ;;  %v58_v4 = vld [vmem:[#allocation5 + $0x10] sm:$0xff]  ;;  %vm62_vm2 = vcmask 130048   ;;  %v966_v14 = vmov 0   ;;  %v515_v15 = vlaneseq  ;;  %vm598_vm3 = vcmask 130112  }
  0x28   :  { %820 = vmatprep.mubr.msk.f32.mxu0 %vm964_vm0, %v965_v1  ;;  %827 = vmatprep.mubr.msk.f32.mxu1 %vm964_vm0, %v965_v1  ;;  %v859_v5 = vpack.c.bf16 %v57_v3, %v56_v2  ;;  %v59_v6 = vld [vmem:[#allocation5 + $0x18] sm:$0xff]  ;;  %v61_v7 = vld [vmem:[%s1095_s2 + $0x1] sm:$0x1]  ;;  %v795_v9 = vld [vmem:[%s1096_s3] ss:$0 sm:$0xff]  ;;  %vm605_vm4 = vcmask 195712  }
  0x29   :  { %v862_v8 = vpack.c.bf16 %v59_v6, %v58_v4  ;;  %v511_v10 = vsel %vm501_vm1, %v61_v7, 0.0  ;;  %v60_v11 = vld [vmem:[%s1095_s2] sm:$0x1]  ;;  %529 = vbcast.lane.b32.xlu0 %v795_v9, 256  ;;  %885 = vset.pattern.permute.xlu1 %v966_v14  ;;  %v1052_v16 = vshrl.u32 %v515_v15, 7  ;;  %v54_v37 = vld [vmem:[#allocation2 + $0x10] sm:$0xff] }
  0x2a   :  { %860 = vmatpush3.bf16.msra.mxu0 %v859_v5  ;;  %v796_v12 = vld [vmem:[%s1097_s4] ss:$0 sm:$0xff]  ;;  %512 = vadd.xlane.f32.xlu1 %v511_v10  ;;  %v508_v13 = vsel %vm501_vm1, %v60_v11, 0.0  ;;  %v55_v38 = vld [vmem:[#allocation2 + $0x18] sm:$0xff]  ;;  %v53_v41 = vld [vmem:[#allocation2 + $0x8] sm:$0xff]  ;;  %vm612_vm5 = vcmask 261312  }
  0x2b   :  { %863 = vmatpush3.bf16.msra.mxu1 %v862_v8  ;;  %864 = vmatprep.subr.bf16.mxu0 %v963_v0  ;;  %v517_v18 = vsub.s32 0, %v1052_v16  ;;  %v874_v39 = vpack.c.bf16 %v55_v38, %v54_v37  ;;  %v52_v40 = vld [vmem:[#allocation2] sm:$0xff]  ;;  %s967_s4 = smov [#allocation7]   ;;  %vm768_vm6 = vcmask 1041409   ;;  %vm771_vm7 = vcmask 254976  }
  0x2c   :  { %867 = vmatprep.subr.bf16.mxu1 %v963_v0  ;;  %886 = vset.pattern.permute.xlu0 %v966_v14  ;;  %v871_v42 = vpack.c.bf16 %v53_v41, %v52_v40  ;;  %s779_s29 = sshll.u32 %s967_s4, 4  ;;  %s780_s29 = int_to_ptr.vmem [resolvable:$true] %s779_s29 }
  0x2d   :  { %821 = vmatmul.mubr.msk.f32.vlgmr.msra.gmra.mrb[0].mxu0 %vm62_vm2, %v60_v11  ;;  %652 = vbcast.lane.b32.xlu0 %v796_v12, 256  ;;  %s931_s30 = scalar_lea.vmem %s780_s29, 32  ;;  %p936_p3 = scmp.lt.s32.totalorder %s780_s29, %s780_s29 }
  0x2e   :  { %828 = vmatmul.mubr.msk.f32.vlgmr.msra.gmra.mrb[0].mxu1 %vm62_vm2, %v61_v7  ;;  %509 = vadd.xlane.f32.xlu1 %v508_v13  ;;  %p932_p2 = scmp.ne.s32.totalorder %s780_s29, %s931_s30  ;;  %p937_p4 = scmp.lt.s32.totalorder %s931_s30, %s931_s30 }
  0x2f   :  { %869 = vmatpush3.bf16.msra.mxu1 %v862_v8  ;;  %866 = vmatpush3.bf16.msra.mxu0 %v859_v5 }
  0x30   :  { %834 = vmatprep.mubr.msk.f32.mxu0 %vm964_vm0, %v965_v1  ;;  %841 = vmatprep.mubr.msk.f32.mxu1 %vm964_vm0, %v965_v1  ;;  %p938_p5 = por %p937_p4, %p936_p3 }
  0x31   :  { %873 = vmatprep.subr.bf16.mxu1 %v963_v0  ;;  %870 = vmatprep.subr.bf16.mxu0 %v963_v0 }
  0x32   :  { %p939_p6 = pnand %p938_p5, %p932_p2 }
  0x3f   :  { %533 = vbcast.lane.b32.xlu1 %v795_v9, 264 }
  0x43   :  { %537 = vbcast.lane.b32.xlu1 %v795_v9, 272 }
  0x47   :  { %541 = vbcast.lane.b32.xlu1 %v795_v9, 280 }
  0x4b   :  { %656 = vbcast.lane.b32.xlu1 %v796_v12, 264 }
  0x4f   :  { %664 = vbcast.lane.b32.xlu1 %v796_v12, 280 }
  0x9b   :  { %v1054_v17 = vpop.permute.xlu0 %529 }
  0x9f   :  { %v653_v20 = vpop.permute.xlu0 %652 }
  0xb7   :  { %v513_v19 = vpop.xlane.xlu1 %512 }
  0xb8   :  { %v645_v21 = vrot.slane %v513_v19, %v517_v18 }
  0xba   :  { %v674_v22 = vmul.f32 %v653_v20, %v645_v21 }
  0xbb   :  { %v510_v23 = vpop.xlane.xlu1 %509 }
  0xbc   :  { %699 = vperm.xlu1 %885, %v674_v22   ;;  %v641_v27 = vrot.slane %v510_v23, %v517_v18 }
  0xbe   :  { %v670_v51 = vmul.f32 %v653_v20, %v641_v27 }
  0xbf   :  { %v534_v24 = vpop.permute.xlu1 %533 }
  0xc3   :  { %v538_v25 = vpop.permute.xlu1 %537 }
  0xc7   :  { %v542_v26 = vpop.permute.xlu1 %541 }
  0xcb   :  { %v657_v28 = vpop.permute.xlu1 %656 }
  0xcc   :  { %v671_v29 = vmul.f32 %v657_v28, %v641_v27  ;;  %v675_v36 = vmul.f32 %v657_v28, %v645_v21 }
  0xce   :  { %690 = vperm.xlu1 %885, %v671_v29  }
  0xcf   :  { %v665_v53 = vpop.permute.xlu1 %664 }
  0xd0   :  { %v677_v54 = vmul.f32 %v665_v53, %v645_v21  ;;  %v673_v61 = vmul.f32 %v665_v53, %v641_v27 }
 0x100   :  { %v132_v30 = vpop.f32.mrb[0].mxu0 }
 0x101   :  { %v205_v31 = vpop.f32.mrb[0].mxu1  ;;  %835 = vmatmul.mubr.msk.f32.vlgmr.msra.gmra.mrb[2].mxu0 %vm62_vm2, %v132_v30  ;;  %v822_v32 = vpop.f32.mrb[1].mxu0  ;;  %v502_v35 = vsel %vm501_vm1, %v132_v30, 0.0 }
 0x102   :  { %v829_v33 = vpop.f32.mrb[1].mxu1  ;;  %842 = vmatmul.mubr.msk.f32.vlgmr.msra.gmra.mrb[2].mxu1 %vm62_vm2, %v205_v31  ;;  %v505_v34 = vsel %vm501_vm1, %v205_v31, 0.0  ;;  %848 = vmatprep.mubr.msk.f32.mxu0 %vm964_vm0, %v965_v1 }
 0x103   :  { %506 = vadd.xlane.f32.xlu0 %v505_v34  ;;  %855 = vmatprep.mubr.msk.f32.mxu1 %vm964_vm0, %v965_v1 }
 0x104   :  { %875 = vmatpush3.bf16.msra.mxu1 %v874_v39  ;;  %872 = vmatpush3.bf16.msra.mxu0 %v871_v42 }
 0x107   :  { %503 = vadd.xlane.f32.xlu0 %v502_v35 }
 0x11d   :  { %660 = vbcast.lane.b32.xlu0 %v796_v12, 272  ;;  %v588_v12 = vand.u32 127, %v515_v15 }
 0x11f   :  { %v600_v20 = vadd.s32 4294967280, %v588_v12  ;;  %v607_v22 = vadd.s32 4294967272, %v588_v12 }
 0x121   :  { %702 = vperm.xlu0 %886, %v675_v36   ;;  %v603_v15 = vsub.s32 %v600_v20, %v1052_v16  ;;  %v610_v32 = vsub.s32 %v607_v22, %v1052_v16 }
 0x13b   :  { %v700_v2 = vpop.permute.xlu1 %699 }
 0x14d   :  { %v691_v4 = vpop.permute.xlu1 %690 }
 0x190   :  { %v507_v43 = vpop.xlane.xlu0 %506 }
 0x191   :  { %v522_v44 = vrot.slane %v507_v43, %v517_v18 }
 0x193   :  { %v552_v45 = vmul.f32 %v534_v24, %v522_v44  ;;  %v553_v48 = vmul.f32 %v538_v25, %v522_v44  ;;  %v551_v58 = vmul.f32 %v1054_v17, %v522_v44  ;;  %v554_v60 = vmul.f32 %v542_v26, %v522_v44 }
 0x194   :  { %v504_v46 = vpop.xlane.xlu0 %503 }
 0x195   :  { %579 = vperm.xlu1 %885, %v552_v45   ;;  %v518_v47 = vrot.slane %v504_v46, %v517_v18  ;;  %v591_v18 = vsub.s32 %v588_v12, %v1052_v16 }
 0x197   :  { %v548_v52 = vmul.f32 %v534_v24, %v518_v47  ;;  %v549_v55 = vmul.f32 %v538_v25, %v518_v47  ;;  %v550_v56 = vmul.f32 %v542_v26, %v518_v47  ;;  %v547_v59 = vmul.f32 %v1054_v17, %v518_v47 }
 0x198   :  { %v661_v49 = vpop.permute.xlu0 %660  ;;  %v593_v17 = vadd.s32 4294967288, %v588_v12  ;;  %v732_v24 = vrot.slane %v700_v2, %v591_v18 }
 0x199   :  { %v676_v50 = vmul.f32 %v661_v49, %v645_v21  ;;  %582 = vperm.xlu1 %885, %v553_v48   ;;  %v672_v57 = vmul.f32 %v661_v49, %v641_v27 }
 0x19a   :  { %v596_v21 = vsub.s32 %v593_v17, %v1052_v16 }
 0x19b   :  { %705 = vperm.xlu0 %886, %v676_v50  }
 0x19c   :  { %v717_v26 = vrot.slane %v691_v4, %v596_v21 }
 0x19d   :  { %567 = vperm.xlu1 %885, %v548_v52  }
 0x19f   :  { %687 = vperm.xlu0 %886, %v670_v51  }
 0x1a0   :  { %v703_v3 = vpop.permute.xlu0 %702 }
 0x1a1   :  { %570 = vperm.xlu1 %885, %v549_v55   ;;  %v736_v27 = vrot.slane %v703_v3, %v596_v21 }
 0x1a3   :  { %708 = vperm.xlu0 %886, %v677_v54   ;;  %v737_v38 = vsel %vm598_vm3, %v736_v27, %v732_v24 }
 0x1a5   :  { %573 = vperm.xlu1 %885, %v550_v56  }
 0x1a7   :  { %576 = vperm.xlu0 %886, %v551_v58  }
 0x1a9   :  { %693 = vperm.xlu1 %885, %v672_v57  }
 0x1ab   :  { %564 = vperm.xlu0 %886, %v547_v59  }
 0x1af   :  { %585 = vperm.xlu0 %886, %v554_v60  }
 0x1b3   :  { %696 = vperm.xlu0 %886, %v673_v61  }
 0x1d4   :  { %v278_v62 = vpop.f32.mrb[2].mxu0 }
 0x1d5   :  { %v351_v63 = vpop.f32.mrb[2].mxu1  ;;  %849 = vmatmul.mubr.msk.f32.vlgmr.msra.gmra.mrb[4].mxu0 %vm62_vm2, %v278_v62  ;;  %v836_v0 = vpop.f32.mrb[3].mxu0 }
 0x1d6   :  { %v843_v1 = vpop.f32.mrb[3].mxu1  ;;  %856 = vmatmul.mubr.msk.f32.vlgmr.msra.gmra.mrb[4].mxu1 %vm62_vm2, %v351_v63  ;;  %v797_v63 = vld [vmem:[%s1098_s5] ss:$0 sm:$0xff] }
 0x214   :  { %v580_v6 = vpop.permute.xlu1 %579 }
 0x215   :  { %v621_v34 = vrot.slane %v580_v6, %v596_v21 }
 0x218   :  { %v583_v8 = vpop.permute.xlu1 %582 }
 0x219   :  { %v626_v44 = vrot.slane %v583_v8, %v603_v15 }
 0x21a   :  { %v706_v5 = vpop.permute.xlu0 %705 }
 0x21b   :  { %v741_v39 = vrot.slane %v706_v5, %v603_v15 }
 0x21c   :  { %v568_v10 = vpop.permute.xlu1 %567 }
 0x21d   :  { %v597_v28 = vrot.slane %v568_v10, %v596_v21  ;;  %v742_v49 = vsel %vm605_vm4, %v741_v39, %v737_v38 }
 0x21e   :  { %v688_v7 = vpop.permute.xlu0 %687 }
 0x21f   :  { %v713_v29 = vrot.slane %v688_v7, %v591_v18 }
 0x220   :  { %v571_v13 = vpop.permute.xlu1 %570 }
 0x221   :  { %v604_v35 = vrot.slane %v571_v13, %v603_v15  ;;  %v718_v40 = vsel %vm598_vm3, %v717_v26, %v713_v29 }
 0x222   :  { %v709_v9 = vpop.permute.xlu0 %708 }
 0x223   :  { %v746_v47 = vrot.slane %v709_v9, %v610_v32 }
 0x224   :  { %v574_v19 = vpop.permute.xlu1 %573 }
 0x225   :  { %v611_v45 = vrot.slane %v574_v19, %v610_v32  ;;  %v747_v60 = vsel %vm612_vm5, %v746_v47, %v742_v49 }
 0x226   :  { %v577_v11 = vpop.permute.xlu0 %576 }
 0x227   :  { %v617_v31 = vrot.slane %v577_v11, %v591_v18 }
 0x228   :  { %v694_v30 = vpop.permute.xlu1 %693 }
 0x229   :  { %v722_v36 = vrot.slane %v694_v30, %v603_v15  ;;  %v622_v41 = vsel %vm598_vm3, %v621_v34, %v617_v31 }
 0x22a   :  { %v565_v14 = vpop.permute.xlu0 %564  ;;  %v627_v51 = vsel %vm605_vm4, %v626_v44, %v622_v41 }
 0x22b   :  { %v592_v23 = vrot.slane %v565_v14, %v591_v18  ;;  %v723_v48 = vsel %vm605_vm4, %v722_v36, %v718_v40 }
 0x22d   :  { %v599_v33 = vsel %vm598_vm3, %v597_v28, %v592_v23 }
 0x22e   :  { %v586_v25 = vpop.permute.xlu0 %585  ;;  %v606_v43 = vsel %vm605_vm4, %v604_v35, %v599_v33 }
 0x22f   :  { %v631_v42 = vrot.slane %v586_v25, %v610_v32  ;;  %v613_v50 = vsel %vm612_vm5, %v611_v45, %v606_v43 }
 0x231   :  { %v632_v54 = vsel %vm612_vm5, %v631_v42, %v627_v51 }
 0x232   :  { %v697_v37 = vpop.permute.xlu0 %696 }
 0x233   :  { %v727_v46 = vrot.slane %v697_v37, %v610_v32 }
 0x235   :  { %v728_v56 = vsel %vm612_vm5, %v727_v46, %v723_v48 }
 0x2a8   :  { %v424_v16 = vpop.f32.mrb[4].mxu0 }
 0x2a9   :  { %v635_v52 = vadd.f32 %v613_v50, %v424_v16  ;;  %v497_v53 = vpop.f32.mrb[4].mxu1  ;;  %v850_v55 = vpop.f32.mrb[5].mxu0 }
 0x2aa   :  { %v636_v57 = vadd.f32 %v632_v54, %v497_v53  ;;  %v857_v58 = vpop.f32.mrb[5].mxu1 }
 0x2ab   :  { %v750_v59 = vadd.f32 %v728_v56, %v635_v52 }
 0x2ac   :  { %v751_v61 = vadd.f32 %v747_v60, %v636_v57 }
 0x2ad   :  { %v752_v62 = vmul.f32 0.125, %v750_v59 }
 0x2ae   :  { %v753_v0 = vmul.f32 0.125, %v751_v61 }
 0x2af   :  { %v761_v1 = vadd.f32 %v797_v63, %v752_v62 }
 0x2b0   :  { %v762_v2 = vadd.f32 %v797_v63, %v753_v0 }
 0x2b1   :  { %v763_v4 = vmax.f32 %v761_v1, 0.0 }
 0x2b2   :  { %v764_v3 = vmax.f32 %v762_v2, 0.0 }
 0x2b4   :  { %v767_v5 = vrot.slane %v764_v3, 7 }
 0x2b6   :  { %v769_v6 = vsel %vm768_vm6, %v767_v5, %v763_v4 }
 0x2b7   :  { %772 = vst.msk [vmem:[#allocation7] sm:$0x3] %vm771_vm7, %v769_v6 }
 0x2b8   :  { %942 = shalt.err (!%p939_p6)
}
 0x2b9   :  { %s943_s8 = scalar_lea.hbm %s1099_s6, 32 }
 0x2ba   :  { %p944_p7 = scmp.ne.s32.totalorder %s1099_s6, %s943_s8  ;;  %p947_p8 = scmp.lt.u32.totalorder %s943_s8, %s1099_s6 }
 0x2bc   :  { %p949_p9 = pnand %p947_p8, %p944_p7 }
 0x2be   :  { %952 = shalt.err (!%p949_p9)
}
 0x2bf   :  { %782 = dma.vmem_to_hbm [thread:$0]  %s780_s29, 32, %s1099_s6, [#allocation4]  }
 0x2c0   :  { %957 = dma.done.wait [#allocation4], 32  }
 0x2c1   :  { %958 = vsyncadd [#allocation4], 4294967264 }
 0x2c2   :  { %786 = vsyncpa [#allocation3], 1 }
 0x2c3   :  { %787 = vsyncpa [#allocation6], 1 }
 0x2c4   :  { %788 = vsyncpa [#allocation4], 1 }

</bundles_post_ra>
